<compile_context>
chip_gen: v5e
topology: v5e:2x2
jax: 0.10.0
libtpu: 0.0.40
codegen_flags: <defaults>
</compile_context>

<pallas_src>
import jax
import jax.numpy as jnp
from jax.experimental import pallas as pl
from jax.experimental.pallas import tpu as pltpu


# ---------------------------------------------------------------------------
# Pallas kernel: one batch image per grid step, fully lane-dense tiles.
# ---------------------------------------------------------------------------
def _resblock_kernel(x_ref, w1_ref, s1_ref, b1_ref, w2_ref, s2_ref, b2_ref,
                     out_ref):
    """x_ref/out_ref: (1, H, W*C) f32 (lane-dense rows).
    w*_ref: (3*W*C, W*C) bf16 kh-stacked block-tridiagonal conv weights.
    s*/b*_ref: (1, W*C) f32 folded BatchNorm scale/bias."""
    H = x_ref.shape[1]

    # Single HBM->VMEM read of the input; it is also the residual.
    x = x_ref[0]                                          # (H, W*C) f32

    # Exact 0/1 row-shift matrices (built once, reused by both convs):
    #   shift_prev @ a -> a[h-1]  (row 0   becomes zero = top padding)
    #   shift_next @ a -> a[h+1]  (row H-1 becomes zero = bottom padding)
    r = jax.lax.broadcasted_iota(jnp.int32, (H, H), 0)
    c = jax.lax.broadcasted_iota(jnp.int32, (H, H), 1)
    shift_prev = (c == r - 1).astype(jnp.bfloat16)
    shift_next = (c == r + 1).astype(jnp.bfloat16)

    def im2row(a):
        # Row-wise im2col over the kh taps: columns [a[h-1] | a[h] | a[h+1]].
        # The shift matmuls are exact (0/1 selection), and the concat sits on
        # 128-lane-aligned boundaries.
        ab = a.astype(jnp.bfloat16)
        prev = jnp.dot(shift_prev, ab,
                       preferred_element_type=jnp.float32).astype(jnp.bfloat16)
        nxt = jnp.dot(shift_next, ab,
                      preferred_element_type=jnp.float32).astype(jnp.bfloat16)
        return jnp.concatenate([prev, ab, nxt], axis=1)    # (H, 3*W*C) bf16

    def conv_bn(a, w_ref, s_ref, b_ref):
        # 3x3 conv as a single (H, 3WC) x (3WC, WC) bf16 MXU matmul with f32
        # accumulation, then the folded BatchNorm (scale/bias) in f32.
        acc = jnp.dot(im2row(a), w_ref[...],
                      preferred_element_type=jnp.float32)  # (H, W*C) f32
        return acc * s_ref[...] + b_ref[...]

    y1 = jnp.maximum(conv_bn(x, w1_ref, s1_ref, b1_ref), 0.0)   # conv1+BN1+ReLU
    y2 = conv_bn(y1, w2_ref, s2_ref, b2_ref)                    # conv2+BN2
    out = jnp.maximum(y2 + x, 0.0)                              # +residual, ReLU
    out_ref[...] = out.reshape(out_ref.shape).astype(out_ref.dtype)


# ---------------------------------------------------------------------------
# Weight packing: fold the kw taps (and left/right zero padding) into a
# block-tridiagonal (3*W*Cin, W*Cout) matmul weight.
# ---------------------------------------------------------------------------
def _pack_conv_weight(w, width):
    """(3, 3, Cin, Cout) -> (3*W*Cin, W*Cout) bf16.

    Row block kh is sum_kw kron(S_dw, w[kh, kw]) with S_dw[ws, wd] = 1 iff
    ws == wd + (kw - 1), so the horizontal taps and the image-border zeroing
    are handled entirely inside the weight."""
    _, _, cin, cout = w.shape
    ws = jnp.arange(width)[:, None]     # source column index  (w)
    wd = jnp.arange(width)[None, :]     # destination column index (w')
    row_blocks = []
    for kh in range(3):
        blk = jnp.zeros((width * cin, width * cout), jnp.float32)
        for kw in range(3):
            dw = kw - 1
            sel = (ws == wd + dw).astype(jnp.float32)      # (W, W) shifted "eye"
            blk = blk + jnp.einsum(
                "xy,io->xiyo", sel, w[kh, kw].astype(jnp.float32)
            ).reshape(width * cin, width * cout)
        row_blocks.append(blk)
    return jnp.concatenate(row_blocks, axis=0).astype(jnp.bfloat16)


# ---------------------------------------------------------------------------
# Wrapper: folds BN, packs weights, launches the kernel over the batch.
# ---------------------------------------------------------------------------
@jax.jit
def residual_block(x_nhwc, w1, b1, bn1, w2, b2, bn2):
    """x_nhwc: (N,H,W,C) f32.  w*: (3,3,Cin,Cout).  b*: (Cout,) conv bias.
    bn*: dict(gamma, beta, mean, var) per channel (inference-mode BatchNorm)."""
    N, H, W, C = x_nhwc.shape
    Cout = w1.shape[-1]
    if Cout != C or w2.shape[-1] != Cout:
        raise ValueError("identity residual requires in_channels == out_channels "
                         "(stride=1, downsample=None)")
    eps = 1e-5
    WC = W * C

    def fold(bn, conv_bias):
        scale = bn["gamma"] / jnp.sqrt(bn["var"] + eps)
        bias = (conv_bias - bn["mean"]) * scale + bn["beta"]
        # Tile per-channel params across W to match the (W*C) lane layout.
        return (jnp.tile(scale, W).reshape(1, WC).astype(jnp.float32),
                jnp.tile(bias, W).reshape(1, WC).astype(jnp.float32))

    s1, fb1 = fold(bn1, b1)
    s2, fb2 = fold(bn2, b2)
    w1b = _pack_conv_weight(w1, W)      # (3*W*C, W*C) bf16
    w2b = _pack_conv_weight(w2, W)

    # Lane-dense view (contiguous reshape => free).  W*C = 128 for the example.
    x_flat = x_nhwc.reshape(N, H, WC).astype(jnp.float32)

    out_flat = pl.pallas_call(
        _resblock_kernel,
        out_shape=jax.ShapeDtypeStruct((N, H, WC), jnp.float32),
        grid=(N,),
        in_specs=[
            pl.BlockSpec((1, H, WC), lambda n: (n, 0, 0)),     # x (read once)
            pl.BlockSpec((3 * WC, WC), lambda n: (0, 0)),      # conv1 weights
            pl.BlockSpec((1, WC), lambda n: (0, 0)),           # BN1 scale
            pl.BlockSpec((1, WC), lambda n: (0, 0)),           # BN1 bias
            pl.BlockSpec((3 * WC, WC), lambda n: (0, 0)),      # conv2 weights
            pl.BlockSpec((1, WC), lambda n: (0, 0)),           # BN2 scale
            pl.BlockSpec((1, WC), lambda n: (0, 0)),           # BN2 bias
        ],
        out_specs=pl.BlockSpec((1, H, WC), lambda n: (n, 0, 0)),
        compiler_params=pltpu.CompilerParams(
            dimension_semantics=("parallel",)),
    )(x_flat, w1b, s1, fb1, w2b, s2, fb2)

    return out_flat.reshape(N, H, W, Cout)


# ---------------------------------------------------------------------------
# Pure-JAX f32 reference (same math) for a correctness check.
# ---------------------------------------------------------------------------
def reference(x_nhwc, w1, b1, bn1, w2, b2, bn2):
    eps = 1e-5
    dn = ("NHWC", "HWIO", "NHWC")

    def conv_bn(x, w, b, bn, relu):
        y = jax.lax.conv_general_dilated(x, w, (1, 1), "SAME",
                                         dimension_numbers=dn) + b
        y = (y - bn["mean"]) / jnp.sqrt(bn["var"] + eps) * bn["gamma"] + bn["beta"]
        return jnp.maximum(y, 0.0) if relu else y

    out = conv_bn(x_nhwc, w1, b1, bn1, True)
    out = conv_bn(out, w2, b2, bn2, False)
    return jnp.maximum(out + x_nhwc, 0.0)


if __name__ == "__main__":
    key = jax.random.PRNGKey(0)
    N, C, H, W = 2, 8, 16, 16          # NCHW shape of the PyTorch input; W*C = 128
    Cin = Cout = C                      # identity residual => in == out channels

    ks = jax.random.split(key, 10)
    x_nchw = jax.random.normal(ks[0], (N, C, H, W), jnp.float32)
    w1 = jax.random.normal(ks[1], (3, 3, Cin, Cout), jnp.float32) * 0.1
    b1 = jax.random.normal(ks[2], (Cout,), jnp.float32) * 0.1
    w2 = jax.random.normal(ks[3], (3, 3, Cout, Cout), jnp.float32) * 0.1
    b2 = jax.random.normal(ks[4], (Cout,), jnp.float32) * 0.1
    bn1 = dict(gamma=jax.random.uniform(ks[5], (Cout,), jnp.float32, 0.5, 1.5),
               beta=jax.random.normal(ks[6], (Cout,), jnp.float32) * 0.1,
               mean=jax.random.normal(ks[7], (Cout,), jnp.float32) * 0.1,
               var=jax.random.uniform(ks[8], (Cout,), jnp.float32, 0.5, 1.5))
    bn2 = dict(gamma=jnp.ones((Cout,), jnp.float32),
               beta=jnp.zeros((Cout,), jnp.float32),
               mean=jax.random.normal(ks[9], (Cout,), jnp.float32) * 0.1,
               var=jnp.ones((Cout,), jnp.float32))

    # NCHW -> NHWC for the kernel (PyTorch reference layout is NCHW).
    x_nhwc = jnp.transpose(x_nchw, (0, 2, 3, 1))

    out = residual_block(x_nhwc, w1, b1, bn1, w2, b2, bn2)
    out = jax.block_until_ready(out)

    ref = reference(x_nhwc, w1, b1, bn1, w2, b2, bn2)
    assert out.shape == (N, H, W, Cout)
    # Looser tolerance than f32-only: the MXU operands are bf16 (accumulation,
    # BN/ReLU epilogue and residual add are exact f32).
    err = float(jnp.max(jnp.abs(out - ref)))
    assert jnp.allclose(out, ref, atol=5e-2, rtol=5e-2), err

    print("KERNEL_OK")
</pallas_src>

<mosaic_0001>
module attributes {stable_mosaic.version = 11 : i64} {
  func.func @_resblock_kernel(%arg0: i32, %arg1: memref<1x16x128xf32, #tpu.memory_space<vmem>>, %arg2: memref<384x128xbf16, #tpu.memory_space<vmem>>, %arg3: memref<1x128xf32, #tpu.memory_space<vmem>>, %arg4: memref<1x128xf32, #tpu.memory_space<vmem>>, %arg5: memref<384x128xbf16, #tpu.memory_space<vmem>>, %arg6: memref<1x128xf32, #tpu.memory_space<vmem>>, %arg7: memref<1x128xf32, #tpu.memory_space<vmem>>, %arg8: memref<1x16x128xf32, #tpu.memory_space<vmem>>) attributes {dimension_semantics = [#tpu.dimension_semantics<parallel>], iteration_bounds = array<i64: 2>, scalar_prefetch = 0 : i64, scratch_operands = 0 : i64, tpu.core_type = #tpu.core_type<tc>, window_params = [{transform_indices = @transform_0, window_bounds = array<i64: 1, 16, 128>}, {pipeline_mode = #tpu.pipeline_mode<synchronous>, transform_indices = @transform_1, window_bounds = array<i64: 384, 128>}, {pipeline_mode = #tpu.pipeline_mode<synchronous>, transform_indices = @transform_2, window_bounds = array<i64: 1, 128>}, {pipeline_mode = #tpu.pipeline_mode<synchronous>, transform_indices = @transform_3, window_bounds = array<i64: 1, 128>}, {pipeline_mode = #tpu.pipeline_mode<synchronous>, transform_indices = @transform_4, window_bounds = array<i64: 384, 128>}, {pipeline_mode = #tpu.pipeline_mode<synchronous>, transform_indices = @transform_5, window_bounds = array<i64: 1, 128>}, {pipeline_mode = #tpu.pipeline_mode<synchronous>, transform_indices = @transform_6, window_bounds = array<i64: 1, 128>}, {transform_indices = @transform_7, window_bounds = array<i64: 1, 16, 128>}]} {
    %c0 = arith.constant 0 : index
    %c0_0 = arith.constant 0 : index
    %c0_1 = arith.constant 0 : index
    %0 = vector.load %arg1[%c0, %c0_0, %c0_1] : memref<1x16x128xf32, #tpu.memory_space<vmem>>, vector<1x16x128xf32>
    %1 = vector.shape_cast %0 : vector<1x16x128xf32> to vector<16x128xf32>
    %2 = tpu.iota {dimensions = array<i32: 0>} : vector<16x16xi32>
    %3 = tpu.iota {dimensions = array<i32: 1>} : vector<16x16xi32>
    %c1_i32 = arith.constant 1 : i32
    %4 = vector.broadcast %c1_i32 : i32 to vector<16x16xi32>
    %5 = arith.subi %2, %4 : vector<16x16xi32>
    %6 = arith.cmpi eq, %3, %5 : vector<16x16xi32>
    %7 = arith.extui %6 : vector<16x16xi1> to vector<16x16xi32>
    %8 = arith.sitofp %7 : vector<16x16xi32> to vector<16x16xf32>
    %9 = arith.truncf %8 : vector<16x16xf32> to vector<16x16xbf16>
    %c1_i32_2 = arith.constant 1 : i32
    %10 = vector.broadcast %c1_i32_2 : i32 to vector<16x16xi32>
    %11 = arith.addi %2, %10 : vector<16x16xi32>
    %12 = arith.cmpi eq, %3, %11 : vector<16x16xi32>
    %13 = arith.extui %12 : vector<16x16xi1> to vector<16x16xi32>
    %14 = arith.sitofp %13 : vector<16x16xi32> to vector<16x16xf32>
    %15 = arith.truncf %14 : vector<16x16xf32> to vector<16x16xbf16>
    %16 = arith.truncf %1 : vector<16x128xf32> to vector<16x128xbf16>
    %cst = arith.constant dense<0.000000e+00> : vector<16x128xf32>
    %17 = tpu.matmul %9, %16, %cst {dimension_numbers = #tpu.dot_dimension_numbers<[1], [0], [0], [1], [0, 0, 1, 1], [], []>} : vector<16x16xbf16>, vector<16x128xbf16>, vector<16x128xf32> -> vector<16x128xf32>
    %18 = arith.truncf %17 : vector<16x128xf32> to vector<16x128xbf16>
    %cst_3 = arith.constant dense<0.000000e+00> : vector<16x128xf32>
    %19 = tpu.matmul %15, %16, %cst_3 {dimension_numbers = #tpu.dot_dimension_numbers<[1], [0], [0], [1], [0, 0, 1, 1], [], []>} : vector<16x16xbf16>, vector<16x128xbf16>, vector<16x128xf32> -> vector<16x128xf32>
    %20 = arith.truncf %19 : vector<16x128xf32> to vector<16x128xbf16>
    %21 = tpu.concatenate %18, %16, %20 in 1 : vector<16x128xbf16>, vector<16x128xbf16>, vector<16x128xbf16> -> vector<16x384xbf16>
    %c0_4 = arith.constant 0 : index
    %c0_5 = arith.constant 0 : index
    %22 = vector.load %arg2[%c0_4, %c0_5] : memref<384x128xbf16, #tpu.memory_space<vmem>>, vector<384x128xbf16>
    %cst_6 = arith.constant dense<0.000000e+00> : vector<16x128xf32>
    %23 = tpu.matmul %21, %22, %cst_6 {dimension_numbers = #tpu.dot_dimension_numbers<[1], [0], [0], [1], [0, 0, 1, 1], [], []>} : vector<16x384xbf16>, vector<384x128xbf16>, vector<16x128xf32> -> vector<16x128xf32>
    %c0_7 = arith.constant 0 : index
    %c0_8 = arith.constant 0 : index
    %24 = vector.load %arg3[%c0_7, %c0_8] : memref<1x128xf32, #tpu.memory_space<vmem>>, vector<1x128xf32>
    %25 = vector.broadcast %24 : vector<1x128xf32> to vector<16x128xf32>
    %26 = arith.mulf %23, %25 : vector<16x128xf32>
    %c0_9 = arith.constant 0 : index
    %c0_10 = arith.constant 0 : index
    %27 = vector.load %arg4[%c0_9, %c0_10] : memref<1x128xf32, #tpu.memory_space<vmem>>, vector<1x128xf32>
    %28 = vector.broadcast %27 : vector<1x128xf32> to vector<16x128xf32>
    %29 = arith.addf %26, %28 : vector<16x128xf32>
    %cst_11 = arith.constant 0.000000e+00 : f32
    %30 = vector.broadcast %cst_11 : f32 to vector<16x128xf32>
    %31 = arith.maximumf %29, %30 : vector<16x128xf32>
    %32 = arith.truncf %31 : vector<16x128xf32> to vector<16x128xbf16>
    %cst_12 = arith.constant dense<0.000000e+00> : vector<16x128xf32>
    %33 = tpu.matmul %9, %32, %cst_12 {dimension_numbers = #tpu.dot_dimension_numbers<[1], [0], [0], [1], [0, 0, 1, 1], [], []>} : vector<16x16xbf16>, vector<16x128xbf16>, vector<16x128xf32> -> vector<16x128xf32>
    %34 = arith.truncf %33 : vector<16x128xf32> to vector<16x128xbf16>
    %cst_13 = arith.constant dense<0.000000e+00> : vector<16x128xf32>
    %35 = tpu.matmul %15, %32, %cst_13 {dimension_numbers = #tpu.dot_dimension_numbers<[1], [0], [0], [1], [0, 0, 1, 1], [], []>} : vector<16x16xbf16>, vector<16x128xbf16>, vector<16x128xf32> -> vector<16x128xf32>
    %36 = arith.truncf %35 : vector<16x128xf32> to vector<16x128xbf16>
    %37 = tpu.concatenate %34, %32, %36 in 1 : vector<16x128xbf16>, vector<16x128xbf16>, vector<16x128xbf16> -> vector<16x384xbf16>
    %c0_14 = arith.constant 0 : index
    %c0_15 = arith.constant 0 : index
    %38 = vector.load %arg5[%c0_14, %c0_15] : memref<384x128xbf16, #tpu.memory_space<vmem>>, vector<384x128xbf16>
    %cst_16 = arith.constant dense<0.000000e+00> : vector<16x128xf32>
    %39 = tpu.matmul %37, %38, %cst_16 {dimension_numbers = #tpu.dot_dimension_numbers<[1], [0], [0], [1], [0, 0, 1, 1], [], []>} : vector<16x384xbf16>, vector<384x128xbf16>, vector<16x128xf32> -> vector<16x128xf32>
    %c0_17 = arith.constant 0 : index
    %c0_18 = arith.constant 0 : index
    %40 = vector.load %arg6[%c0_17, %c0_18] : memref<1x128xf32, #tpu.memory_space<vmem>>, vector<1x128xf32>
    %41 = vector.broadcast %40 : vector<1x128xf32> to vector<16x128xf32>
    %42 = arith.mulf %39, %41 : vector<16x128xf32>
    %c0_19 = arith.constant 0 : index
    %c0_20 = arith.constant 0 : index
    %43 = vector.load %arg7[%c0_19, %c0_20] : memref<1x128xf32, #tpu.memory_space<vmem>>, vector<1x128xf32>
    %44 = vector.broadcast %43 : vector<1x128xf32> to vector<16x128xf32>
    %45 = arith.addf %42, %44 : vector<16x128xf32>
    %46 = arith.addf %45, %1 : vector<16x128xf32>
    %cst_21 = arith.constant 0.000000e+00 : f32
    %47 = vector.broadcast %cst_21 : f32 to vector<16x128xf32>
    %48 = arith.maximumf %46, %47 : vector<16x128xf32>
    %49 = vector.shape_cast %48 : vector<16x128xf32> to vector<1x16x128xf32>
    %c0_22 = arith.constant 0 : index
    %c0_23 = arith.constant 0 : index
    %c0_24 = arith.constant 0 : index
    %50 = vector.load %arg8[%c0_22, %c0_23, %c0_24] : memref<1x16x128xf32, #tpu.memory_space<vmem>>, vector<1x16x128xf32>
    tpu.vector_store %arg8[%c0_22, %c0_23, %c0_24], %49 {strides = array<i32>} : memref<1x16x128xf32, #tpu.memory_space<vmem>>, vector<1x16x128xf32>,
    return
  }
  func.func @transform_0(%arg0: i32) -> (i32, i32, i32) {
    %c0_i32 = arith.constant 0 : i32
    %c0_i32_0 = arith.constant 0 : i32
    %c0_i32_1 = arith.constant 0 : i32
    return %arg0, %c0_i32, %c0_i32_0 : i32, i32, i32
  }
  func.func @transform_1(%arg0: i32) -> (i32, i32) {
    %c0_i32 = arith.constant 0 : i32
    %c0_i32_0 = arith.constant 0 : i32
    %c0_i32_1 = arith.constant 0 : i32
    return %c0_i32, %c0_i32_0 : i32, i32
  }
  func.func @transform_2(%arg0: i32) -> (i32, i32) {
    %c0_i32 = arith.constant 0 : i32
    %c0_i32_0 = arith.constant 0 : i32
    %c0_i32_1 = arith.constant 0 : i32
    return %c0_i32, %c0_i32_0 : i32, i32
  }
  func.func @transform_3(%arg0: i32) -> (i32, i32) {
    %c0_i32 = arith.constant 0 : i32
    %c0_i32_0 = arith.constant 0 : i32
    %c0_i32_1 = arith.constant 0 : i32
    return %c0_i32, %c0_i32_0 : i32, i32
  }
  func.func @transform_4(%arg0: i32) -> (i32, i32) {
    %c0_i32 = arith.constant 0 : i32
    %c0_i32_0 = arith.constant 0 : i32
    %c0_i32_1 = arith.constant 0 : i32
    return %c0_i32, %c0_i32_0 : i32, i32
  }
  func.func @transform_5(%arg0: i32) -> (i32, i32) {
    %c0_i32 = arith.constant 0 : i32
    %c0_i32_0 = arith.constant 0 : i32
    %c0_i32_1 = arith.constant 0 : i32
    return %c0_i32, %c0_i32_0 : i32, i32
  }
  func.func @transform_6(%arg0: i32) -> (i32, i32) {
    %c0_i32 = arith.constant 0 : i32
    %c0_i32_0 = arith.constant 0 : i32
    %c0_i32_1 = arith.constant 0 : i32
    return %c0_i32, %c0_i32_0 : i32, i32
  }
  func.func @transform_7(%arg0: i32) -> (i32, i32, i32) {
    %c0_i32 = arith.constant 0 : i32
    %c0_i32_0 = arith.constant 0 : i32
    %c0_i32_1 = arith.constant 0 : i32
    return %arg0, %c0_i32, %c0_i32_0 : i32, i32, i32
  }
}

</mosaic_0001>

<bundles_post_ra>
// kernel: tile.23
= control target key start
LH: loop header
LB: loop body
LE: loop exit
PB: predicated region body
PF: predicated region fallthrough
CT: control target
= control target key end

     0   :  { %s28_s0 = inlined_call_operand.vmem [shape: f32[8], index: 0, kind: input, shape index: {}]   ;;  %s29_s1 = inlined_call_operand.vmem [shape: f32[16,8], index: 1, kind: output, shape index: {}]  }
   0x1   :  { %v4_v0 = vld [vmem:[%s28_s0] ss:$0 sm:$0xff] }
   0x2   :  { %5 = vst [vmem:[%s29_s1] sm:$0xff] %v4_v0 }
   0x3   :  { %8 = vst [vmem:[%s29_s1 + $0x8] sm:$0xff] %v4_v0 }

// kernel: tile.24
= control target key start
LH: loop header
LB: loop body
LE: loop exit
PB: predicated region body
PF: predicated region fallthrough
CT: control target
= control target key end

     0   :  { %s131_s10 = smov 120   ;;  %s132_s11 = smov 104   ;;  %vm3_vm0 = vcmask 64512   ;;  %vm9_vm1 = vcmask 1048512   ;;  %vm15_vm2 = vcmask 982912   ;;  %vm21_vm3 = vcmask 917312   ;;  %s207_s0 = inlined_call_operand.vmem [shape: f32[16,8], index: 0, kind: input, shape index: {}]   ;;  %s208_s1 = inlined_call_operand.vmem [shape: f32[1,128], index: 1, kind: output, shape index: {}]  }
   0x1   :  { %v101_v0 = vld [vmem:[%s207_s0 + $0xf] sm:$0x1]   ;;  %v103_v1 = vld [vmem:[%s207_s0 + $0xd] sm:$0x1]   ;;  %v105_v2 = vld [vmem:[%s207_s0 + $0xb] sm:$0x1]  }
   0x2   :  { %7 = vrot.lane.b32.xlu0 %v101_v0, %s131_s10  ;;  %19 = vrot.lane.b32.xlu1 %v103_v1, %s132_s11  ;;  %s133_s14 = smov 88   ;;  %v102_v3 = vld [vmem:[%s207_s0 + $0xe] sm:$0x1]   ;;  %v104_v4 = vld [vmem:[%s207_s0 + $0xc] sm:$0x1]   ;;  %s134_s19 = smov 112  }
   0x3   :  { %31 = vrot.lane.b32.xlu2 %v105_v2, %s133_s14  ;;  %s135_s20 = smov 96   ;;  %v106_v5 = vld [vmem:[%s207_s0 + $0xa] sm:$0x1]   ;;  %s136_s23 = smov 80   ;;  %v107_v6 = vld [vmem:[%s207_s0 + $0x9] sm:$0x1]  }
   0x4   :  { %v108_v7 = vld [vmem:[%s207_s0 + $0x8] sm:$0x1]   ;;  %s137_s28 = smov 72   ;;  %s138_s29 = smov 64   ;;  %v109_v8 = vld [vmem:[%s207_s0 + $0x7] sm:$0x1]  }
   0x5   :  { %s139_s3 = smov 56   ;;  %v110_v9 = vld [vmem:[%s207_s0 + $0x6] sm:$0x1]   ;;  %v111_v10 = vld [vmem:[%s207_s0 + $0x5] sm:$0x1]   ;;  %s140_s8 = smov 48  }
   0x6   :  { %s141_s9 = smov 40   ;;  %v112_v11 = vld [vmem:[%s207_s0 + $0x4] sm:$0x1]   ;;  %s142_s12 = smov 32   ;;  %v113_v12 = vld [vmem:[%s207_s0 + $0x3] sm:$0x1]  }
   0x7   :  { %v114_v13 = vld [vmem:[%s207_s0 + $0x2] sm:$0x1]   ;;  %s143_s17 = smov 24   ;;  %s144_s18 = smov 16   ;;  %v115_v14 = vld [vmem:[%s207_s0 + $0x1] sm:$0x1]  }
   0x8   :  { %s145_s21 = smov 8   ;;  %v2_v15 = vld [vmem:[%s207_s0] sm:$0x1]   ;;  %vm27_vm4 = vcmask 851712   ;;  %vm33_vm5 = vcmask 786112   ;;  %vm39_vm6 = vcmask 720512  }
   0x9   :  { %4 = vst.msk [vmem:[#allocation0] sm:$0x1] %vm3_vm0, %v2_v15   ;;  %vm45_vm7 = vcmask 654912   ;;  %vm51_vm8 = vcmask 589312   ;;  %vm57_vm9 = vcmask 523712   ;;  %vm63_vm10 = vcmask 458112  }
   0xa   :  { %13 = vrot.lane.b32.xlu0 %v102_v3, %s134_s19  ;;  %25 = vrot.lane.b32.xlu1 %v104_v4, %s135_s20  ;;  %vm69_vm11 = vcmask 392512   ;;  %vm75_vm12 = vcmask 326912   ;;  %vm81_vm13 = vcmask 261312   ;;  %vm87_vm14 = vcmask 195712  }
   0xb   :  { %37 = vrot.lane.b32.xlu2 %v106_v5, %s136_s23  ;;  %vm93_vm15 = vcmask 130112  }
  0x12   :  { %43 = vrot.lane.b32.xlu0 %v107_v6, %s137_s28  ;;  %49 = vrot.lane.b32.xlu1 %v108_v7, %s138_s29 }
  0x13   :  { %55 = vrot.lane.b32.xlu2 %v109_v8, %s139_s3 }
  0x1a   :  { %61 = vrot.lane.b32.xlu0 %v110_v9, %s140_s8  ;;  %67 = vrot.lane.b32.xlu1 %v111_v10, %s141_s9 }
  0x1b   :  { %73 = vrot.lane.b32.xlu2 %v112_v11, %s142_s12 }
  0x22   :  { %79 = vrot.lane.b32.xlu0 %v113_v12, %s143_s17  ;;  %85 = vrot.lane.b32.xlu1 %v114_v13, %s144_s18 }
  0x23   :  { %91 = vrot.lane.b32.xlu2 %v115_v14, %s145_s21 }
  0x5d   :  { %v32_v16 = vpop.permute.xlu2 %31  }
  0x65   :  { %v38_v17 = vpop.permute.xlu2 %37  }
  0x6d   :  { %v56_v18 = vpop.permute.xlu2 %55  }
  0x74   :  { %v8_v19 = vpop.permute.xlu0 %7   ;;  %v20_v20 = vpop.permute.xlu1 %19  }
  0x75   :  { %10 = vst.msk [vmem:[#allocation0] sm:$0x1] %vm9_vm1, %v8_v19   ;;  %v74_v21 = vpop.permute.xlu2 %73  }
  0x7c   :  { %v14_v22 = vpop.permute.xlu0 %13   ;;  %v26_v23 = vpop.permute.xlu1 %25  }
  0x7d   :  { %16 = vst.msk [vmem:[#allocation0] sm:$0x1] %vm15_vm2, %v14_v22   ;;  %v92_v24 = vpop.permute.xlu2 %91  }
  0x7e   :  { %22 = vst.msk [vmem:[#allocation0] sm:$0x1] %vm21_vm3, %v20_v20  }
  0x7f   :  { %28 = vst.msk [vmem:[#allocation0] sm:$0x1] %vm27_vm4, %v26_v23  }
  0x80   :  { %34 = vst.msk [vmem:[#allocation0] sm:$0x1] %vm33_vm5, %v32_v16  }
  0x81   :  { %40 = vst.msk [vmem:[#allocation0] sm:$0x1] %vm39_vm6, %v38_v17  }
  0x84   :  { %v44_v25 = vpop.permute.xlu0 %43   ;;  %v50_v26 = vpop.permute.xlu1 %49  }
  0x85   :  { %46 = vst.msk [vmem:[#allocation0] sm:$0x1] %vm45_vm7, %v44_v25  }
  0x86   :  { %52 = vst.msk [vmem:[#allocation0] sm:$0x1] %vm51_vm8, %v50_v26  }
  0x87   :  { %58 = vst.msk [vmem:[#allocation0] sm:$0x1] %vm57_vm9, %v56_v18  }
  0x8c   :  { %v62_v27 = vpop.permute.xlu0 %61   ;;  %v68_v28 = vpop.permute.xlu1 %67  }
  0x8d   :  { %64 = vst.msk [vmem:[#allocation0] sm:$0x1] %vm63_vm10, %v62_v27  }
  0x8e   :  { %70 = vst.msk [vmem:[#allocation0] sm:$0x1] %vm69_vm11, %v68_v28  }
  0x8f   :  { %76 = vst.msk [vmem:[#allocation0] sm:$0x1] %vm75_vm12, %v74_v21  }
  0x94   :  { %v80_v29 = vpop.permute.xlu0 %79   ;;  %v86_v30 = vpop.permute.xlu1 %85  }
  0x95   :  { %82 = vst.msk [vmem:[#allocation0] sm:$0x1] %vm81_vm13, %v80_v29  }
  0x96   :  { %88 = vst.msk [vmem:[#allocation0] sm:$0x1] %vm87_vm14, %v86_v30  }
  0x97   :  { %94 = vst.msk [vmem:[#allocation0] sm:$0x1] %vm93_vm15, %v92_v24  }
  0x9e   :  { %v97_v31 = vld [vmem:[#allocation0] sm:$0x1] }
  0x9f   :  { %100 = vst [vmem:[%s208_s1] sm:$0x1] %v97_v31 }

// kernel: residual_block.1
= control target key start
LH: loop header
LB: loop body
LE: loop exit
PB: predicated region body
PF: predicated region fallthrough
CT: control target
= control target key end

     0   :  { %s1296_s24 = smov 0   ;;  %s1498_s0 = inlined_call_operand.vmem [shape: f32[2,16,128], index: 0, kind: input, shape index: {}]   ;;  %s1499_s1 = inlined_call_operand.vmem [shape: bf16[384,128], index: 1, kind: input, shape index: {}]   ;;  %s1500_s2 = inlined_call_operand.vmem [shape: f32[1,128], index: 2, kind: input, shape index: {}]   ;;  %s1501_s3 = inlined_call_operand.vmem [shape: f32[1,128], index: 3, kind: input, shape index: {}]   ;;  %s1502_s4 = inlined_call_operand.vmem [shape: bf16[384,128], index: 4, kind: input, shape index: {}]   ;;  %s1503_s5 = inlined_call_operand.vmem [shape: f32[1,128], index: 5, kind: input, shape index: {}]   ;;  %s1504_s6 = inlined_call_operand.vmem [shape: f32[1,128], index: 6, kind: input, shape index: {}]   ;;  %s1505_s7 = inlined_call_operand.vmem [shape: f32[2,16,128], index: 7, kind: output, shape index: {}]  }
   0x1 LB: > { %s971_s25 = sadd.s32 4294967295, %s1253_s24   ;;  %p975_p0 = scmp.ge.s32.totalorder %s1253_s24, 1  ;;  %s1253_s24 = sphi %s1296_s24, %s17_s24  }
   0x2   : > { %p237_p1 = scmp.lt.s32.totalorder %s1253_s24, 3 }
   0x4   : > { %p238_p2 = pnand %p975_p0, %p237_p1 }
   0x5   : > { %p269_p3 = scmp.lt.s32.totalorder (!%p238_p2), %s971_s25, 1 }
   0x6   : > { %241 = sbr.rel (%p238_p2) target bundleno = 632 (0x278), region = 48 }
   0xb   : > { %v282_v0 = vlaneseq  ;;  %v1193_v1 = vld [vmem:[%s1499_s1 + $0x38] sm:$0xff]  ;;  %s1507_s25 = smov (!%p269_p3, %s971_s25), 1  ;;  %v1192_v5 = vld [vmem:[%s1499_s1 + $0x30] sm:$0xff]  ;;  %v1191_v9 = vld [vmem:[%s1499_s1 + $0x28] sm:$0xff]  ;;  %v1255_v18 = vmov 0.0   ;;  %vm313_vm2 = vcmask 130048  }
   0xc   : > { %v1201_v2 = vld [vmem:[%s1499_s1 + $0x78] sm:$0xff]  ;;  %556 = vmatpush.bf16.msra.mxu2 %v1193_v1  ;;  %v1200_v6 = vld [vmem:[%s1499_s1 + $0x70] sm:$0xff]  ;;  %s1184_s11 = sshll.u32 %s1507_s25, 4  ;;  %v1199_v13 = vld [vmem:[%s1499_s1 + $0x68] sm:$0xff] }
   0xd   : > { %v283_v3 = vshrl.u32 %v282_v0, 7  ;;  %v286_v4 = vand.u32 127, %v282_v0  ;;  %570 = vmatpush.bf16.msra.mxu3 %v1201_v2  ;;  %s273_s14 = scalar_lea.vmem %s1498_s0, %s1184_s11  ;;  %v1190_v21 = vld [vmem:[%s1499_s1 + $0x20] sm:$0xff]  ;;  %v1189_v30 = vld [vmem:[%s1499_s1 + $0x18] sm:$0xff]  ;;  %v1188_v33 = vld [vmem:[%s1499_s1 + $0x10] sm:$0xff]  ;;  %s278_s13 = scalar_lea.vmem %s1505_s7, %s1184_s11 }
   0xe   : > { %v1327_v10 = vld [vmem:[%s273_s14] sm:$0xff]  ;;  %v1329_v11 = vld [vmem:[%s273_s14 + $0x8] sm:$0xff]  ;;  %v1197_v31 = vld [vmem:[%s1499_s1 + $0x58] sm:$0xff] }
   0xf   : > { %v284_v7 = vadd.s32 8, %v283_v3  ;;  %v980_v8 = vadd.s32 4294967295, %v283_v3  ;;  %v305_v14 = vpack.c.bf16 %v1327_v10, %v1327_v10  ;;  %v306_v15 = vpack.c.bf16 %v1329_v11, %v1329_v11  ;;  %v1198_v23 = vld [vmem:[%s1499_s1 + $0x60] sm:$0xff]  ;;  %v1209_v32 = vld [vmem:[%s1499_s1 + $0xb8] sm:$0xff]  ;;  %v1196_v34 = vld [vmem:[%s1499_s1 + $0x50] sm:$0xff] }
  0x10   : > { %557 = vmatpush.bf16.msra.mxu2 %v1192_v5  ;;  %v296_v25 = vadd.s32 1, %v283_v3  ;;  %584 = vmatpush.bf16.msra.mxu0 %v1209_v32  ;;  %v1208_v35 = vld [vmem:[%s1499_s1 + $0xb0] sm:$0xff]  ;;  %v1187_v36 = vld [vmem:[%s1499_s1 + $0x8] sm:$0xff]  ;;  %v1186_v39 = vld [vmem:[%s1499_s1] sm:$0xff] }
  0x11   : > { %v981_v12 = vadd.s32 4294967295, %v284_v7  ;;  %vm289_vm0 = vcmp.eq.s32.totalorder %v286_v4, %v980_v8  ;;  %571 = vmatpush.bf16.msra.mxu3 %v1200_v6  ;;  %v309_v16 = vunpack.c.l.b16 %v305_v14  ;;  %v310_v17 = vunpack.c.l.b16 %v306_v15  ;;  %v1195_v37 = vld [vmem:[%s1499_s1 + $0x48] sm:$0xff]  ;;  %v1194_v40 = vld [vmem:[%s1499_s1 + $0x40] sm:$0xff]  ;;  %v1205_v42 = vld [vmem:[%s1499_s1 + $0x98] sm:$0xff] }
  0x12   : > { %v982_v19 = vsel %vm289_vm0, 1.0, %v1255_v18  ;;  %v297_v26 = vadd.s32 1, %v284_v7  ;;  %vm298_vm3 = vcmp.eq.s32.totalorder %v286_v4, %v296_v25  ;;  %v1207_v38 = vld [vmem:[%s1499_s1 + $0xa8] sm:$0xff]  ;;  %v1206_v41 = vld [vmem:[%s1499_s1 + $0xa0] sm:$0xff]  ;;  %v1204_v43 = vld [vmem:[%s1499_s1 + $0x90] sm:$0xff] }
  0x13   : > { %vm290_vm1 = vcmp.eq.s32.totalorder %v286_v4, %v981_v12  ;;  %v311_v22 = vpack.c.b16 %v310_v17, %v309_v16  ;;  %v984_v27 = vsel %vm298_vm3, 1.0, %v1255_v18  ;;  %v1203_v44 = vld [vmem:[%s1499_s1 + $0x88] sm:$0xff]  ;;  %v1202_v45 = vld [vmem:[%s1499_s1 + $0x80] sm:$0xff]  ;;  %v1225_v60 = vld [vmem:[%s1502_s4 + $0x78] sm:$0xff] }
  0x14   : > { %v983_v20 = vsel %vm290_vm1, 1.0, %v1255_v18  ;;  %558 = vmatpush.bf16.msra.mxu2 %v1191_v9  ;;  %vm299_vm4 = vcmp.eq.s32.totalorder %v286_v4, %v297_v26  ;;  %585 = vmatpush.bf16.msra.mxu0 %v1208_v35  ;;  %v1224_v61 = vld [vmem:[%s1502_s4 + $0x70] sm:$0xff]  ;;  %v1223_v62 = vld [vmem:[%s1502_s4 + $0x68] sm:$0xff]  ;;  %v1222_v63 = vld [vmem:[%s1502_s4 + $0x60] sm:$0xff] }
  0x15   : > { %572 = vmatpush.bf16.msra.mxu3 %v1199_v13  ;;  %v1344_v24 = vpack.c.bf16 %v983_v20, %v982_v19  ;;  %324 = vmatpush.bf16.msra.mxu1 %v311_v22  ;;  %v985_v28 = vsel %vm299_vm4, 1.0, %v1255_v18  ;;  %v1221_v0 = vld [vmem:[%s1502_s4 + $0x58] sm:$0xff]  ;;  %v1220_v1 = vld [vmem:[%s1502_s4 + $0x50] sm:$0xff]  ;;  %v1219_v2 = vld [vmem:[%s1502_s4 + $0x48] sm:$0xff] }
  0x16   : > { %v1348_v29 = vpack.c.bf16 %v985_v28, %v984_v27  ;;  %v1218_v3 = vld [vmem:[%s1502_s4 + $0x40] sm:$0xff]  ;;  %v1217_v20 = vld [vmem:[%s1502_s4 + $0x38] sm:$0xff]  ;;  %v1215_v28 = vld [vmem:[%s1502_s4 + $0x28] sm:$0xff] }
  0x17   : > { %v1243_v7 = vld [vmem:[%s1500_s2] ss:$0 sm:$0xff]  ;;  %v1213_v35 = vld [vmem:[%s1502_s4 + $0x18] sm:$0xff] }
  0x18   : > { %559 = vmatpush.bf16.msra.mxu2 %v1190_v21  ;;  %986 = vmatmul.msk.bf16.vlgmr.msra.gmra.mxu1 %vm313_vm2, %v1344_v24  ;;  %v1244_v13 = vld [vmem:[%s1501_s3] ss:$0 sm:$0xff] }
  0x19   : > { %343 = vmatpush.bf16.msrb.mxu1 %v311_v22  ;;  %573 = vmatpush.bf16.msra.mxu3 %v1198_v23  ;;  %v1216_v23 = vld [vmem:[%s1502_s4 + $0x30] sm:$0xff] }
  0x1a   : > { %586 = vmatpush.bf16.msra.mxu0 %v1207_v38  ;;  %v1231_v38 = vld [vmem:[%s1502_s4 + $0xa8] sm:$0xff] }
  0x1c   : > { %560 = vmatpush.bf16.msra.mxu2 %v1189_v30 }
  0x1d   : > { %574 = vmatpush.bf16.msra.mxu3 %v1197_v31 }
  0x1e   : > { %587 = vmatpush.bf16.msra.mxu0 %v1206_v41  ;;  %v1229_v41 = vld [vmem:[%s1502_s4 + $0x98] sm:$0xff] }
  0x20   : > { %561 = vmatpush.bf16.msra.mxu2 %v1188_v33  ;;  %v1214_v33 = vld [vmem:[%s1502_s4 + $0x20] sm:$0xff] }
  0x21   : > { %575 = vmatpush.bf16.msra.mxu3 %v1196_v34 }
  0x22   : > { %588 = vmatpush.bf16.msra.mxu0 %v1205_v42  ;;  %v1228_v42 = vld [vmem:[%s1502_s4 + $0x90] sm:$0xff] }
  0x24   : > { %562 = vmatpush.bf16.msra.mxu2 %v1187_v36  ;;  %v1233_v36 = vld [vmem:[%s1502_s4 + $0xb8] sm:$0xff] }
  0x25   : > { %576 = vmatpush.bf16.msra.mxu3 %v1195_v37  ;;  %v1212_v37 = vld [vmem:[%s1502_s4 + $0x10] sm:$0xff] }
  0x26   : > { %589 = vmatpush.bf16.msra.mxu0 %v1204_v43  ;;  %v1227_v43 = vld [vmem:[%s1502_s4 + $0x88] sm:$0xff] }
  0x28   : > { %987 = vmatmul.msk.bf16.vlgmr.msrb.gmra.mxu1 %vm313_vm2, %v1348_v29  ;;  %563 = vmatpush.bf16.msra.mxu2 %v1186_v39  ;;  %v1210_v39 = vld [vmem:[%s1502_s4] sm:$0xff] }
  0x29   : > { %577 = vmatpush.bf16.msra.mxu3 %v1194_v40  ;;  %v1230_v40 = vld [vmem:[%s1502_s4 + $0xa0] sm:$0xff] }
  0x2a   : > { %590 = vmatpush.bf16.msra.mxu0 %v1203_v44  ;;  %v1226_v44 = vld [vmem:[%s1502_s4 + $0x80] sm:$0xff] }
  0x2c   : > { %578 = vmatmul.bf16.vlgmr.msra.gmra.mxu3 %v311_v22  ;;  %856 = vmatpush.bf16.msrb.mxu2 %v1217_v20 }
  0x2d   : > { %870 = vmatpush.bf16.msrb.mxu3 %v1225_v60 }
  0x2e   : > { %591 = vmatpush.bf16.msra.mxu0 %v1202_v45 }
  0x30   : > { %857 = vmatpush.bf16.msrb.mxu2 %v1216_v23 }
  0x31   : > { %871 = vmatpush.bf16.msrb.mxu3 %v1224_v61 }
  0x32   : > { %884 = vmatpush.bf16.msrb.mxu0 %v1233_v36 }
  0x34   : > { %858 = vmatpush.bf16.msrb.mxu2 %v1215_v28 }
  0x35   : > { %872 = vmatpush.bf16.msrb.mxu3 %v1223_v62  ;;  %v1245_v62 = vld [vmem:[%s1503_s5] ss:$0 sm:$0xff] }
  0x38   : > { %859 = vmatpush.bf16.msrb.mxu2 %v1214_v33 }
  0x39   : > { %873 = vmatpush.bf16.msrb.mxu3 %v1222_v63 }
  0x3c   : > { %860 = vmatpush.bf16.msrb.mxu2 %v1213_v35 }
  0x3d   : > { %874 = vmatpush.bf16.msrb.mxu3 %v1221_v0 }
  0x40   : > { %861 = vmatpush.bf16.msrb.mxu2 %v1212_v37 }
  0x41   : > { %875 = vmatpush.bf16.msrb.mxu3 %v1220_v1  ;;  %v1246_v1 = vld [vmem:[%s1504_s6] ss:$0 sm:$0xff] }
  0x45   : > { %876 = vmatpush.bf16.msrb.mxu3 %v1219_v2 }
  0x49   : > { %877 = vmatpush.bf16.msrb.mxu3 %v1218_v3 }
  0x95   : > { %v326_v46 = vpop.f32.mrf.mxu1 }
  0x96   : > { %v331_v47 = vpack.c.bf16 %v326_v46, %v326_v46 }
  0x98   : > { %v354_v50 = vunpack.c.l.b16 %v331_v47 }
  0x9d   : > { %v328_v48 = vpop.f32.mrf.mxu1 }
  0x9e   : > { %v332_v49 = vpack.c.bf16 %v328_v48, %v328_v48 }
  0xa0   : > { %v355_v51 = vunpack.c.l.b16 %v332_v49 }
  0xa2   : > { %v356_v52 = vpack.c.b16 %v355_v51, %v354_v50 }
  0xa4   : > { %564 = vmatmul.bf16.vlgmr.msra.gmra.mxu2 %v356_v52 }
  0xa5   : > { %v345_v53 = vpop.f32.mrf.mxu1 }
  0xa6   : > { %v350_v54 = vpack.c.bf16 %v345_v53, %v345_v53 }
  0xa8   : > { %v360_v57 = vunpack.c.l.b16 %v350_v54 }
  0xad   : > { %v347_v55 = vpop.f32.mrf.mxu1 }
  0xae   : > { %v351_v56 = vpack.c.bf16 %v347_v55, %v347_v55 }
  0xaf   : > { %v579_v5 = vpop.f32.mrf.mxu3 }
  0xb0   : > { %v361_v58 = vunpack.c.l.b16 %v351_v56 }
  0xb2   : > { %v362_v59 = vpack.c.b16 %v361_v58, %v360_v57 }
  0xb4   : > { %592 = vmatmul.bf16.vlgmr.msra.gmra.mxu0 %v362_v59 }
  0xb7   : > { %v581_v15 = vpop.f32.mrf.mxu3 }
 0x127   : > { %v565_v4 = vpop.f32.mrf.mxu2 }
 0x128   : > { %v580_v6 = vadd.f32 %v579_v5, %v565_v4 }
 0x12f   : > { %v567_v14 = vpop.f32.mrf.mxu2 }
 0x130   : > { %v582_v16 = vadd.f32 %v581_v15, %v567_v14 }
 0x131   : > { %v593_v8 = vpop.f32.mrf.mxu0 }
 0x132   : > { %v594_v9 = vadd.f32 %v593_v8, %v580_v6 }
 0x134   : > { %v602_v12 = vmul.f32 %v1243_v7, %v594_v9 }
 0x136   : > { %v608_v17 = vadd.f32 %v1244_v13, %v602_v12 }
 0x138   : > { %v610_v21 = vmax.f32 %v608_v17, 0.0 }
 0x139   : > { %v595_v18 = vpop.f32.mrf.mxu0 }
 0x13a   : > { %v596_v19 = vadd.f32 %v595_v18, %v582_v16  ;;  %v612_v26 = vpack.c.bf16 %v610_v21, %v610_v21 }
 0x13c   : > { %v603_v22 = vmul.f32 %v1243_v7, %v596_v19  ;;  %v616_v31 = vunpack.c.l.b16 %v612_v26 }
 0x13e   : > { %v609_v25 = vadd.f32 %v1244_v13, %v603_v22 }
 0x140   : > { %v611_v27 = vmax.f32 %v609_v25, 0.0 }
 0x142   : > { %v613_v30 = vpack.c.bf16 %v611_v27, %v611_v27 }
 0x144   : > { %v617_v32 = vunpack.c.l.b16 %v613_v30 }
 0x146   : > { %v618_v34 = vpack.c.b16 %v617_v32, %v616_v31 }
 0x148   : > { %627 = vmatpush.bf16.msra.mxu1 %v618_v34  ;;  %878 = vmatmul.bf16.vlgmr.msrb.gmra.mxu3 %v618_v34 }
 0x14b   : > { %1084 = vmatmul.msk.bf16.vlgmr.msra.gmra.mxu1 %vm313_vm2, %v1344_v24  ;;  %v1232_v24 = vld [vmem:[%s1502_s4 + $0xb0] sm:$0xff] }
 0x14c   : > { %643 = vmatpush.bf16.msrb.mxu1 %v618_v34  ;;  %885 = vmatpush.bf16.msrb.mxu0 %v1232_v24 }
 0x150   : > { %886 = vmatpush.bf16.msrb.mxu0 %v1231_v38 }
 0x154   : > { %887 = vmatpush.bf16.msrb.mxu0 %v1230_v40 }
 0x158   : > { %888 = vmatpush.bf16.msrb.mxu0 %v1229_v41 }
 0x15b   : > { %1085 = vmatmul.msk.bf16.vlgmr.msrb.gmra.mxu1 %vm313_vm2, %v1348_v29  ;;  %v1211_v29 = vld [vmem:[%s1502_s4 + $0x8] sm:$0xff] }
 0x15c   : > { %862 = vmatpush.bf16.msrb.mxu2 %v1211_v29  ;;  %889 = vmatpush.bf16.msrb.mxu0 %v1228_v42 }
 0x160   : > { %863 = vmatpush.bf16.msrb.mxu2 %v1210_v39  ;;  %890 = vmatpush.bf16.msrb.mxu0 %v1227_v43 }
 0x164   : > { %891 = vmatpush.bf16.msrb.mxu0 %v1226_v44 }
 0x1c8   : > { %v629_v45 = vpop.f32.mrf.mxu1 }
 0x1c9   : > { %v634_v46 = vpack.c.bf16 %v629_v45, %v629_v45 }
 0x1cb   : > { %v654_v49 = vunpack.c.l.b16 %v634_v46  ;;  %v879_v60 = vpop.f32.mrf.mxu3 }
 0x1d0   : > { %v631_v47 = vpop.f32.mrf.mxu1 }
 0x1d1   : > { %v635_v48 = vpack.c.bf16 %v631_v47, %v631_v47 }
 0x1d3   : > { %v655_v50 = vunpack.c.l.b16 %v635_v48  ;;  %v881_v5 = vpop.f32.mrf.mxu3 }
 0x1d5   : > { %v656_v51 = vpack.c.b16 %v655_v50, %v654_v49 }
 0x1d7   : > { %864 = vmatmul.bf16.vlgmr.msrb.gmra.mxu2 %v656_v51 }
 0x1d8   : > { %v645_v52 = vpop.f32.mrf.mxu1 }
 0x1d9   : > { %v650_v53 = vpack.c.bf16 %v645_v52, %v645_v52 }
 0x1db   : > { %v660_v56 = vunpack.c.l.b16 %v650_v53 }
 0x1e0   : > { %v647_v54 = vpop.f32.mrf.mxu1 }
 0x1e1   : > { %v651_v55 = vpack.c.bf16 %v647_v54, %v647_v54 }
 0x1e3   : > { %v661_v57 = vunpack.c.l.b16 %v651_v55 }
 0x1e5   : > { %v662_v58 = vpack.c.b16 %v661_v57, %v660_v56 }
 0x1e7   : > { %892 = vmatmul.bf16.vlgmr.msrb.gmra.mxu0 %v662_v58 }
 0x25a   : > { %v865_v59 = vpop.f32.mrf.mxu2 }
 0x25b   : > { %v880_v61 = vadd.f32 %v879_v60, %v865_v59 }
 0x262   : > { %v867_v3 = vpop.f32.mrf.mxu2 }
 0x263   : > { %v882_v6 = vadd.f32 %v881_v5, %v867_v3 }
 0x264   : > { %v893_v63 = vpop.f32.mrf.mxu0 }
 0x265   : > { %v894_v0 = vadd.f32 %v893_v63, %v880_v61 }
 0x267   : > { %v902_v2 = vmul.f32 %v1245_v62, %v894_v0 }
 0x269   : > { %v908_v4 = vadd.f32 %v1246_v1, %v902_v2 }
 0x26b   : > { %v910_v7 = vadd.f32 %v908_v4, %v1327_v10 }
 0x26c   : > { %v895_v8 = vpop.f32.mrf.mxu0 }
 0x26d   : > { %v912_v9 = vmax.f32 %v910_v7, 0.0  ;;  %v896_v12 = vadd.f32 %v895_v8, %v882_v6 }
 0x26f   : > { %914 = vst [vmem:[%s278_s13] sm:$0xff] %v912_v9  ;;  %v903_v13 = vmul.f32 %v1245_v62, %v896_v12 }
 0x271   : > { %v909_v14 = vadd.f32 %v1246_v1, %v903_v13 }
 0x273   : > { %v911_v15 = vadd.f32 %v909_v14, %v1329_v11 }
 0x275   : > { %v913_v16 = vmax.f32 %v911_v15, 0.0 }
 0x277   : > { %915 = vst [vmem:[%s278_s13 + $0x8] sm:$0xff] %v913_v16 }
 0x278 PF: > { %s17_s24 = sadd.s32 1, %s1253_s24  }
 0x279   : > { %p14_p4 = scmp.ge.s32.totalorder %s17_s24, 4  }
 0x27b   :  { %16 = sbr.rel (!%p14_p4) target bundleno = 1 (0x1), region = 78 }

</bundles_post_ra>
